<compile_context>
chip_gen: v5e
topology: v5e:2x2
jax: 0.10.0
libtpu: 0.0.40
codegen_flags: <defaults>
</compile_context>

<pallas_src>
import functools

import jax
import jax.numpy as jnp
from jax.experimental import pallas as pl
from jax.experimental.pallas import tpu as pltpu


def _round_up(x, m):
    return ((x + m - 1) // m) * m


def _critic_kernel(x_ref, w_ref, b_ref, o_ref, *, state_dim):
    # x_ref: (TB, S)   unpadded state tile (ragged rows undefined, discarded)
    # w_ref: (3, P, P) packed weights (slot0=w1 rows :S, slot1=w2, slot2 row0=w3^T)
    # b_ref: (3, P)    packed biases, always f32
    # o_ref: (1, TB)   lane-dense value row
    cdt = w_ref.dtype                          # MXU input dtype (f32 or bf16)

    x = x_ref[...].astype(cdt)                 # (TB, S)
    w1 = w_ref[0][:state_dim, :]               # (S, P)  static value slice
    w2 = w_ref[1]                              # (P, P)
    b1 = b_ref[0:1, :]                         # (1, P)  f32
    b2 = b_ref[1:2, :]                         # (1, P)  f32
    b3 = b_ref[2:3, 0:1]                       # (1, 1)  f32

    # Layer 1: Linear + Tanh (MXU, f32 accumulation; K = state_dim)
    h1 = jnp.tanh(jnp.dot(x, w1, preferred_element_type=jnp.float32) + b1)
    # Layer 2: Linear + Tanh
    h2 = jnp.tanh(jnp.dot(h1.astype(cdt), w2,
                          preferred_element_type=jnp.float32) + b2)

    # Value head: w3^T stored in row 0 of slot 2.  Contract the hidden axis of
    # both operands -> (1, TB): batch on the 128-lane axis, unmasked stores.
    w3t = w_ref[2][0:1, :].astype(jnp.float32)           # (1, P)
    v = jax.lax.dot_general(
        w3t, h2,
        dimension_numbers=(((1,), (1,)), ((), ())),
        preferred_element_type=jnp.float32)               # (1, TB)
    o_ref[...] = (v + b3).astype(o_ref.dtype)


@jax.jit
def critic_forward(state, w_packed, b_packed):
    """state: (B, state_dim).  w_packed: (3, P, P).  b_packed: (3, P) f32."""
    B, state_dim = state.shape
    P = w_packed.shape[-1]

    # Batch-tile heuristic (see header):
    #   * >=128 lanes so the (1, TB) output block is unmasked
    #   * up to 1024 rows/tile to amortize per-grid-step overhead
    #   * >=2 tiles for B > 256 so "parallel" feeds both TensorCores on v7x
    if B <= 256:
        TB = 128
    else:
        TB = min(1024, _round_up(pl.cdiv(B, 2), 128))
    num_tiles = pl.cdiv(B, TB)
    B_pad = num_tiles * TB

    # bf16 staging: match the state dtype to the packed-weight dtype.
    x = state if state.dtype == w_packed.dtype else state.astype(w_packed.dtype)

    out_row = pl.pallas_call(
        functools.partial(_critic_kernel, state_dim=state_dim),
        out_shape=jax.ShapeDtypeStruct((1, B_pad), jnp.float32),
        grid=(num_tiles,),
        in_specs=[
            # state: unpadded, tiled on batch -> pipelined DMA per grid step
            pl.BlockSpec((TB, state_dim), lambda i: (i, 0)),
            # packed weights / biases: constant block index -> VMEM-resident
            pl.BlockSpec((3, P, P), lambda i: (0, 0, 0)),
            pl.BlockSpec((3, P), lambda i: (0, 0)),
        ],
        # lane-dense output row: batch on the lane axis
        out_specs=pl.BlockSpec((1, TB), lambda i: (0, i)),
        compiler_params=pltpu.CompilerParams(
            dimension_semantics=("parallel",)),
    )(x, w_packed, b_packed)

    return out_row[0, :B][:, None]      # (B, 1), matching PyTorch


def init_critic_params(key, state_dim, hidden_dim=64):
    """PyTorch nn.Linear-style init (uniform +-1/sqrt(fan_in)).
    Weights stored transposed: (in_features, out_features); biases (1, out)."""
    ks = jax.random.split(key, 6)

    def linear(kw, kb, fan_in, fan_out):
        bound = 1.0 / jnp.sqrt(jnp.float32(fan_in))
        w = jax.random.uniform(kw, (fan_in, fan_out), jnp.float32, -bound, bound)
        b = jax.random.uniform(kb, (1, fan_out), jnp.float32, -bound, bound)
        return w, b

    w1, b1 = linear(ks[0], ks[1], state_dim, hidden_dim)
    w2, b2 = linear(ks[2], ks[3], hidden_dim, hidden_dim)
    w3, b3 = linear(ks[4], ks[5], hidden_dim, 1)
    return {"w1": w1, "b1": b1, "w2": w2, "b2": b2, "w3": w3, "b3": b3}


def pack_critic_params(params, state_dim, hidden_dim, dtype=jnp.float32):
    """Pack 6 parameter tensors into 2 lane-aligned arrays (done once on host).
    `dtype` controls the MXU input dtype (f32, or bf16 on v6e/v7x); biases stay
    f32 because the kernel epilogue (bias/tanh/head) is always f32."""
    P = _round_up(max(state_dim, hidden_dim, 1), 128)
    w_packed = jnp.zeros((3, P, P), dtype)
    b_packed = jnp.zeros((3, P), jnp.float32)
    w_packed = w_packed.at[0, :state_dim, :hidden_dim].set(
        params["w1"].astype(dtype))
    w_packed = w_packed.at[1, :hidden_dim, :hidden_dim].set(
        params["w2"].astype(dtype))
    # value head stored transposed in row 0 -> lane-dense (1, TB) output
    w_packed = w_packed.at[2, 0, :hidden_dim].set(
        params["w3"][:, 0].astype(dtype))
    b_packed = b_packed.at[0, :hidden_dim].set(params["b1"][0])
    b_packed = b_packed.at[1, :hidden_dim].set(params["b2"][0])
    b_packed = b_packed.at[2, 0].set(params["b3"][0, 0])
    return w_packed, b_packed


def critic_forward_ref(state, params):
    """Plain-JAX reference for correctness checking."""
    h1 = jnp.tanh(state @ params["w1"] + params["b1"])
    h2 = jnp.tanh(h1 @ params["w2"] + params["b2"])
    return h2 @ params["w3"] + params["b3"]


if __name__ == "__main__":
    key = jax.random.PRNGKey(0)
    k_params, k_s0, k_s1, k_s2 = jax.random.split(key, 4)

    batch = 8
    state_dim = 32
    hidden_dim = 64

    params = init_critic_params(k_params, state_dim, hidden_dim)
    w_f32, b_f32 = pack_critic_params(params, state_dim, hidden_dim)

    # Small batch: single partial tile (ragged rows), lane-dense writeback.
    s_small = jax.random.normal(k_s0, (batch, state_dim), jnp.float32)
    out = jax.block_until_ready(critic_forward(s_small, w_f32, b_f32))
    ref = critic_forward_ref(s_small, params)
    assert out.shape == (batch, 1), out.shape
    assert jnp.allclose(out, ref, atol=5e-4, rtol=5e-4)

    # Mid batch: multi-tile grid (TB=256), ragged last tile.
    s_mid = jax.random.normal(k_s1, (300, state_dim), jnp.float32)
    out_mid = jax.block_until_ready(critic_forward(s_mid, w_f32, b_f32))
    ref_mid = critic_forward_ref(s_mid, params)
    assert out_mid.shape == (300, 1), out_mid.shape
    assert jnp.allclose(out_mid, ref_mid, atol=5e-4, rtol=5e-4)

    # Large batch: exercises the TB=1024 rollout path (>=2 tiles for megacore).
    s_big = jax.random.normal(k_s2, (2048, state_dim), jnp.float32)
    out_big = jax.block_until_ready(critic_forward(s_big, w_f32, b_f32))
    ref_big = critic_forward_ref(s_big, params)
    assert out_big.shape == (2048, 1), out_big.shape
    assert jnp.allclose(out_big, ref_big, atol=5e-4, rtol=5e-4)

    # bf16-staged weights + state (v6e/v7x path); f32 accumulation & epilogue.
    w_bf16, b_bf16 = pack_critic_params(params, state_dim, hidden_dim,
                                        dtype=jnp.bfloat16)
    out_bf16 = jax.block_until_ready(critic_forward(s_mid, w_bf16, b_bf16))
    assert out_bf16.shape == (300, 1), out_bf16.shape
    assert jnp.allclose(out_bf16, ref_mid, atol=5e-2, rtol=5e-2)

    print("KERNEL_OK")
</pallas_src>

<mosaic_0001>
module attributes {stable_mosaic.version = 11 : i64} {
  func.func @_critic_kernel(%arg0: i32, %arg1: memref<128x32xf32, #tpu.memory_space<vmem>>, %arg2: memref<3x128x128xf32, #tpu.memory_space<vmem>>, %arg3: memref<3x128xf32, #tpu.memory_space<vmem>>, %arg4: memref<1x128xf32, #tpu.memory_space<vmem>>) attributes {dimension_semantics = [#tpu.dimension_semantics<parallel>], iteration_bounds = array<i64: 1>, scalar_prefetch = 0 : i64, scratch_operands = 0 : i64, tpu.core_type = #tpu.core_type<tc>, window_params = [{transform_indices = @transform_0, window_bounds = array<i64: 128, 32>}, {pipeline_mode = #tpu.pipeline_mode<synchronous>, transform_indices = @transform_1, window_bounds = array<i64: 3, 128, 128>}, {pipeline_mode = #tpu.pipeline_mode<synchronous>, transform_indices = @transform_2, window_bounds = array<i64: 3, 128>}, {transform_indices = @transform_3, window_bounds = array<i64: 1, 128>}]} {
    %c0 = arith.constant 0 : index
    %c0_0 = arith.constant 0 : index
    %0 = vector.load %arg1[%c0, %c0_0] : memref<128x32xf32, #tpu.memory_space<vmem>>, vector<128x32xf32>
    %c0_1 = arith.constant 0 : index
    %c0_2 = arith.constant 0 : index
    %c0_3 = arith.constant 0 : index
    %1 = vector.load %arg2[%c0_1, %c0_2, %c0_3] : memref<3x128x128xf32, #tpu.memory_space<vmem>>, vector<1x128x128xf32>
    %2 = vector.shape_cast %1 : vector<1x128x128xf32> to vector<128x128xf32>
    %3 = vector.extract_strided_slice %2 {offsets = [0, 0], sizes = [32, 128], strides = [1, 1]} : vector<128x128xf32> to vector<32x128xf32>
    %c1 = arith.constant 1 : index
    %c0_4 = arith.constant 0 : index
    %c0_5 = arith.constant 0 : index
    %4 = vector.load %arg2[%c1, %c0_4, %c0_5] : memref<3x128x128xf32, #tpu.memory_space<vmem>>, vector<1x128x128xf32>
    %5 = vector.shape_cast %4 : vector<1x128x128xf32> to vector<128x128xf32>
    %c0_6 = arith.constant 0 : index
    %c0_7 = arith.constant 0 : index
    %6 = vector.load %arg3[%c0_6, %c0_7] : memref<3x128xf32, #tpu.memory_space<vmem>>, vector<1x128xf32>
    %c1_8 = arith.constant 1 : index
    %c0_9 = arith.constant 0 : index
    %7 = vector.load %arg3[%c1_8, %c0_9] : memref<3x128xf32, #tpu.memory_space<vmem>>, vector<1x128xf32>
    %c2 = arith.constant 2 : index
    %c0_10 = arith.constant 0 : index
    %8 = vector.load %arg3[%c2, %c0_10] : memref<3x128xf32, #tpu.memory_space<vmem>>, vector<1x1xf32>
    %cst = arith.constant dense<0.000000e+00> : vector<128x128xf32>
    %9 = tpu.matmul %0, %3, %cst {dimension_numbers = #tpu.dot_dimension_numbers<[1], [0], [0], [1], [0, 0, 1, 1], [], []>} : vector<128x32xf32>, vector<32x128xf32>, vector<128x128xf32> -> vector<128x128xf32>
    %10 = vector.broadcast %6 : vector<1x128xf32> to vector<128x128xf32>
    %11 = arith.addf %9, %10 : vector<128x128xf32>
    %12 = math.tanh %11 : vector<128x128xf32>
    %cst_11 = arith.constant dense<0.000000e+00> : vector<128x128xf32>
    %13 = tpu.matmul %12, %5, %cst_11 {dimension_numbers = #tpu.dot_dimension_numbers<[1], [0], [0], [1], [0, 0, 1, 1], [], []>} : vector<128x128xf32>, vector<128x128xf32>, vector<128x128xf32> -> vector<128x128xf32>
    %14 = vector.broadcast %7 : vector<1x128xf32> to vector<128x128xf32>
    %15 = arith.addf %13, %14 : vector<128x128xf32>
    %16 = math.tanh %15 : vector<128x128xf32>
    %c2_12 = arith.constant 2 : index
    %c0_13 = arith.constant 0 : index
    %c0_14 = arith.constant 0 : index
    %17 = vector.load %arg2[%c2_12, %c0_13, %c0_14] : memref<3x128x128xf32, #tpu.memory_space<vmem>>, vector<1x128x128xf32>
    %18 = vector.shape_cast %17 : vector<1x128x128xf32> to vector<128x128xf32>
    %19 = vector.extract_strided_slice %18 {offsets = [0, 0], sizes = [1, 128], strides = [1, 1]} : vector<128x128xf32> to vector<1x128xf32>
    %cst_15 = arith.constant dense<0.000000e+00> : vector<1x128xf32>
    %20 = tpu.matmul %19, %16, %cst_15 {dimension_numbers = #tpu.dot_dimension_numbers<[1], [1], [0], [0], [0, 0, 1, 0], [], []>} : vector<1x128xf32>, vector<128x128xf32>, vector<1x128xf32> -> vector<1x128xf32>
    %21 = vector.broadcast %8 : vector<1x1xf32> to vector<1x128xf32>
    %22 = arith.addf %20, %21 : vector<1x128xf32>
    %c0_16 = arith.constant 0 : index
    %c0_17 = arith.constant 0 : index
    %23 = vector.load %arg4[%c0_16, %c0_17] : memref<1x128xf32, #tpu.memory_space<vmem>>, vector<1x128xf32>
    tpu.vector_store %arg4[%c0_16, %c0_17], %22 {strides = array<i32>} : memref<1x128xf32, #tpu.memory_space<vmem>>, vector<1x128xf32>,
    return
  }
  func.func @transform_0(%arg0: i32) -> (i32, i32) {
    %c0_i32 = arith.constant 0 : i32
    %c0_i32_0 = arith.constant 0 : i32
    return %arg0, %c0_i32 : i32, i32
  }
  func.func @transform_1(%arg0: i32) -> (i32, i32, i32) {
    %c0_i32 = arith.constant 0 : i32
    %c0_i32_0 = arith.constant 0 : i32
    %c0_i32_1 = arith.constant 0 : i32
    %c0_i32_2 = arith.constant 0 : i32
    return %c0_i32, %c0_i32_0, %c0_i32_1 : i32, i32, i32
  }
  func.func @transform_2(%arg0: i32) -> (i32, i32) {
    %c0_i32 = arith.constant 0 : i32
    %c0_i32_0 = arith.constant 0 : i32
    %c0_i32_1 = arith.constant 0 : i32
    return %c0_i32, %c0_i32_0 : i32, i32
  }
  func.func @transform_3(%arg0: i32) -> (i32, i32) {
    %c0_i32 = arith.constant 0 : i32
    %c0_i32_0 = arith.constant 0 : i32
    return %c0_i32, %arg0 : i32, i32
  }
}

</mosaic_0001>

<bundles_post_ra>
// kernel: critic_forward.1
= control target key start
LH: loop header
LB: loop body
LE: loop exit
PB: predicated region body
PF: predicated region fallthrough
CT: control target
= control target key end

     0   :  { %8 = vsyncpa [#allocation3], 0  ;;  %s626_s0 = inlined_call_operand.hbm [shape: f32[8,32], index: 0, kind: input, shape index: {}]   ;;  %s627_s1 = inlined_call_operand.hbm [shape: f32[3,128,128], index: 1, kind: input, shape index: {}]   ;;  %s628_s2 = inlined_call_operand.hbm [shape: f32[3,128], index: 2, kind: input, shape index: {}]   ;;  %s629_s3 = inlined_call_operand.vmem [shape: f32[1,128], index: 3, kind: output, shape index: {}]  }
   0x1   :  { %9 = vsyncpa [#allocation5], 0 }
   0x2   :  { %13 = vsyncadd [#allocation3], 1920  ;;  %s27_s14 = sshll.u32 %s627_s1, 4  ;;  %s527_s15 = smov [#allocation4]   ;;  %s28_s14 = int_to_ptr.hbm [resolvable:$true] %s27_s14 }
   0x3   :  { %s29_s16 = sshll.u32 %s527_s15, 4  ;;  %s14_s19 = sshll.u32 %s626_s0, 4  ;;  %s30_s16 = int_to_ptr.vmem [resolvable:$true] %s29_s16  ;;  %s15_s19 = int_to_ptr.hbm [resolvable:$true] %s14_s19 }
   0x4   :  { %s528_s20 = smov 128   ;;  %s529_s21 = smov 8  }
   0x5   :  { %35 = dma.hbm_to_vmem [thread:$0]  %s28_s14, 6144, %s30_s16, [#allocation5], %s528_s20, %s528_s20, %s529_s21  }
   0x6   :  { %s530_s22 = smov [#allocation2]   ;;  %s41_s26 = sshll.u32 %s628_s2, 4  ;;  %s42_s26 = int_to_ptr.hbm [resolvable:$true] %s41_s26 }
   0x7   :  { %s16_s23 = sshll.u32 %s530_s22, 4  ;;  %s531_s1 = smov [#allocation6]   ;;  %s17_s23 = int_to_ptr.vmem [resolvable:$true] %s16_s23 }
   0x8   :  { %22 = dma.hbm_to_vmem [thread:$0]  %s15_s19, 128, %s17_s23, [#allocation3], %s528_s20, %s528_s20, %s529_s21  }
   0x9   :  { %s43_s27 = sshll.u32 %s531_s1, 4  ;;  %s44_s27 = int_to_ptr.vmem [resolvable:$true] %s43_s27 }
   0xa   :  { %46 = dma.hbm_to_vmem [thread:$0]  %s42_s26, 64, %s44_s27, [#allocation5]  }
   0xb   :  { %523 = dma.done.wait [#allocation3], 2048  }
   0xc   :  { %524 = vsyncadd [#allocation3], 4294965248 }
   0xd   :  { %525 = dma.done.wait [#allocation5], 6208  }
   0xe   :  { %526 = vsyncadd [#allocation5], 4294961088  ;;  %v78_v0 = vld [vmem:[#allocation4 + $0x18] sm:$0xff]  ;;  %v77_v1 = vld [vmem:[#allocation4 + $0x10] sm:$0xff]  ;;  %vm100_vm0 = vcmask 261120  }
   0xf   :  { %161 = vmatpush.msra.mxu0 %v78_v0  ;;  %v76_v2 = vld [vmem:[#allocation4 + $0x8] sm:$0xff]  ;;  %v75_v3 = vld [vmem:[#allocation4] sm:$0xff]  ;;  %v61_v6 = vld [vmem:[#allocation2 + $0x10] sm:$0xff] }
  0x10   :  { %v59_v4 = vld [vmem:[#allocation2] sm:$0xff]  ;;  %v60_v5 = vld [vmem:[#allocation2 + $0x8] sm:$0xff]  ;;  %v62_v7 = vld [vmem:[#allocation2 + $0x18] sm:$0xff] }
  0x11   :  { %162 = vmatpush.msra.mxu0 %v77_v1  ;;  %v63_v8 = vld [vmem:[#allocation2 + $0x20] sm:$0xff]  ;;  %v64_v9 = vld [vmem:[#allocation2 + $0x28] sm:$0xff]  ;;  %v65_v10 = vld [vmem:[#allocation2 + $0x30] sm:$0xff] }
  0x12   :  { %v66_v11 = vld [vmem:[#allocation2 + $0x38] sm:$0xff]  ;;  %v67_v12 = vld [vmem:[#allocation2 + $0x40] sm:$0xff]  ;;  %v68_v13 = vld [vmem:[#allocation2 + $0x48] sm:$0xff] }
  0x13   :  { %163 = vmatpush.msra.mxu0 %v76_v2  ;;  %v95_v14 = vld [vmem:[#allocation4 + $0xf8] sm:$0xff]  ;;  %v94_v15 = vld [vmem:[#allocation4 + $0xf0] sm:$0xff]  ;;  %v93_v16 = vld [vmem:[#allocation4 + $0xe8] sm:$0xff] }
  0x14   :  { %231 = vmatpush.msra.mxu1 %v95_v14  ;;  %362 = vmatpush.msra.mxu3 %v95_v14  ;;  %v92_v17 = vld [vmem:[#allocation4 + $0xe0] sm:$0xff]  ;;  %v69_v18 = vld [vmem:[#allocation2 + $0x50] sm:$0xff]  ;;  %v91_v19 = vld [vmem:[#allocation4 + $0xd8] sm:$0xff] }
  0x15   :  { %164 = vmatpush.msra.mxu0 %v75_v3  ;;  %v90_v20 = vld [vmem:[#allocation4 + $0xd0] sm:$0xff]  ;;  %v89_v21 = vld [vmem:[#allocation4 + $0xc8] sm:$0xff]  ;;  %v88_v22 = vld [vmem:[#allocation4 + $0xc0] sm:$0xff] }
  0x16   :  { %346 = vmatmul.msk.f32.vlgmr.msra.gmra.mxu0 %vm100_vm0, %v59_v4  ;;  %232 = vmatpush.msra.mxu1 %v94_v15  ;;  %v70_v23 = vld [vmem:[#allocation2 + $0x58] sm:$0xff]  ;;  %v86_v25 = vld [vmem:[#allocation4 + $0xb0] sm:$0xff]  ;;  %v85_v26 = vld [vmem:[#allocation4 + $0xa8] sm:$0xff] }
  0x17   :  { %363 = vmatpush.msra.mxu3 %v94_v15  ;;  %v87_v24 = vld [vmem:[#allocation4 + $0xb8] sm:$0xff]  ;;  %v71_v27 = vld [vmem:[#allocation2 + $0x60] sm:$0xff]  ;;  %v82_v30 = vld [vmem:[#allocation4 + $0x90] sm:$0xff] }
  0x18   :  { %233 = vmatpush.msra.mxu1 %v93_v16  ;;  %v84_v28 = vld [vmem:[#allocation4 + $0xa0] sm:$0xff]  ;;  %v83_v29 = vld [vmem:[#allocation4 + $0x98] sm:$0xff]  ;;  %v81_v31 = vld [vmem:[#allocation4 + $0x88] sm:$0xff] }
  0x19   :  { %364 = vmatpush.msra.mxu3 %v93_v16  ;;  %v72_v32 = vld [vmem:[#allocation2 + $0x68] sm:$0xff]  ;;  %v80_v33 = vld [vmem:[#allocation4 + $0x80] sm:$0xff]  ;;  %v73_v34 = vld [vmem:[#allocation2 + $0x70] sm:$0xff] }
  0x1a   :  { %234 = vmatpush.msra.mxu1 %v92_v17  ;;  %v74_v35 = vld [vmem:[#allocation2 + $0x78] sm:$0xff]  ;;  %v578_v36 = vld [vmem:[#allocation6] ss:$0 sm:$0xff] }
  0x1b   :  { %365 = vmatpush.msra.mxu3 %v92_v17 }
  0x1c   :  { %235 = vmatpush.msra.mxu1 %v91_v19 }
  0x1d   :  { %366 = vmatpush.msra.mxu3 %v91_v19 }
  0x1e   :  { %347 = vmatmul.msk.f32.gmra.mxu0 %vm100_vm0, %v60_v5  ;;  %236 = vmatpush.msra.mxu1 %v90_v20 }
  0x1f   :  { %367 = vmatpush.msra.mxu3 %v90_v20 }
  0x20   :  { %237 = vmatpush.msra.mxu1 %v89_v21 }
  0x21   :  { %368 = vmatpush.msra.mxu3 %v89_v21 }
  0x22   :  { %238 = vmatpush.msra.mxu1 %v88_v22 }
  0x23   :  { %369 = vmatpush.msra.mxu3 %v88_v22 }
  0x24   :  { %239 = vmatpush.msra.mxu1 %v87_v24 }
  0x25   :  { %370 = vmatpush.msra.mxu3 %v87_v24 }
  0x26   :  { %348 = vmatmul.msk.f32.gmra.mxu0 %vm100_vm0, %v61_v6  ;;  %240 = vmatpush.msra.mxu1 %v86_v25 }
  0x27   :  { %371 = vmatpush.msra.mxu3 %v86_v25 }
  0x28   :  { %241 = vmatpush.msra.mxu1 %v85_v26 }
  0x29   :  { %372 = vmatpush.msra.mxu3 %v85_v26 }
  0x2a   :  { %242 = vmatpush.msra.mxu1 %v84_v28 }
  0x2b   :  { %373 = vmatpush.msra.mxu3 %v84_v28 }
  0x2c   :  { %243 = vmatpush.msra.mxu1 %v83_v29 }
  0x2d   :  { %374 = vmatpush.msra.mxu3 %v83_v29 }
  0x2e   :  { %349 = vmatmul.msk.f32.gmra.mxu0 %vm100_vm0, %v62_v7  ;;  %244 = vmatpush.msra.mxu1 %v82_v30 }
  0x2f   :  { %375 = vmatpush.msra.mxu3 %v82_v30 }
  0x30   :  { %245 = vmatpush.msra.mxu1 %v81_v31 }
  0x31   :  { %376 = vmatpush.msra.mxu3 %v81_v31 }
  0x32   :  { %246 = vmatpush.msra.mxu1 %v80_v33 }
  0x33   :  { %377 = vmatpush.msra.mxu3 %v80_v33  ;;  %v602_v33 = vld [vmem:[#allocation6 + $0x1] ss:$0 sm:$0xff] }
  0x36   :  { %350 = vmatmul.msk.f32.gmra.mxu0 %vm100_vm0, %v63_v8 }
  0x3e   :  { %351 = vmatmul.msk.f32.gmra.mxu0 %vm100_vm0, %v64_v9 }
  0x46   :  { %352 = vmatmul.msk.f32.gmra.mxu0 %vm100_vm0, %v65_v10 }
  0x4e   :  { %353 = vmatmul.msk.f32.gmra.mxu0 %vm100_vm0, %v66_v11 }
  0x56   :  { %354 = vmatmul.msk.f32.gmra.mxu0 %vm100_vm0, %v67_v12 }
  0x5e   :  { %355 = vmatmul.msk.f32.gmra.mxu0 %vm100_vm0, %v68_v13 }
  0x66   :  { %356 = vmatmul.msk.f32.gmra.mxu0 %vm100_vm0, %v69_v18 }
  0x6e   :  { %357 = vmatmul.msk.f32.gmra.mxu0 %vm100_vm0, %v70_v23 }
  0x76   :  { %358 = vmatmul.msk.f32.gmra.mxu0 %vm100_vm0, %v71_v27 }
  0x7e   :  { %359 = vmatmul.msk.f32.gmra.mxu0 %vm100_vm0, %v72_v32 }
  0x86   :  { %360 = vmatmul.msk.f32.gmra.mxu0 %vm100_vm0, %v73_v34 }
  0x8e   :  { %361 = vmatmul.msk.f32.gmra.mxu0 %vm100_vm0, %v74_v35 }
  0x93   :  { %v166_v37 = vpop.f32.mrf.mxu0 }
  0x94   :  { %v167_v38 = vadd.f32 %v578_v36, %v166_v37 }
  0x96   :  { %387 = vtanh.f32 %v167_v38 }
  0x9b   :  { %v169_v39 = vpop.f32.mrf.mxu0 }
  0x9c   :  { %v388_v40 = vpop.eup %387  ;;  %v170_v41 = vadd.f32 %v578_v36, %v169_v39 }
  0x9d   :  { %247 = vmatmul.f32.vlgmr.msra.gmra.mxu1 %v388_v40 }
  0x9e   :  { %389 = vtanh.f32 %v170_v41 }
  0xa3   :  { %v172_v42 = vpop.f32.mrf.mxu0 }
  0xa4   :  { %v390_v43 = vpop.eup %389  ;;  %v173_v44 = vadd.f32 %v578_v36, %v172_v42 }
  0xa5   :  { %250 = vmatmul.f32.gmra.mxu1 %v390_v43 }
  0xa6   :  { %391 = vtanh.f32 %v173_v44 }
  0xab   :  { %v175_v45 = vpop.f32.mrf.mxu0 }
  0xac   :  { %v392_v46 = vpop.eup %391  ;;  %v176_v47 = vadd.f32 %v578_v36, %v175_v45 }
  0xad   :  { %253 = vmatmul.f32.gmra.mxu1 %v392_v46 }
  0xae   :  { %393 = vtanh.f32 %v176_v47 }
  0xb3   :  { %v178_v48 = vpop.f32.mrf.mxu0 }
  0xb4   :  { %v394_v49 = vpop.eup %393  ;;  %v179_v50 = vadd.f32 %v578_v36, %v178_v48 }
  0xb5   :  { %256 = vmatmul.f32.gmra.mxu1 %v394_v49 }
  0xb6   :  { %395 = vtanh.f32 %v179_v50 }
  0xbb   :  { %v181_v51 = vpop.f32.mrf.mxu0 }
  0xbc   :  { %v396_v52 = vpop.eup %395  ;;  %v182_v53 = vadd.f32 %v578_v36, %v181_v51 }
  0xbd   :  { %259 = vmatmul.f32.gmra.mxu1 %v396_v52 }
  0xbe   :  { %397 = vtanh.f32 %v182_v53 }
  0xc3   :  { %v184_v54 = vpop.f32.mrf.mxu0 }
  0xc4   :  { %v398_v55 = vpop.eup %397  ;;  %v185_v56 = vadd.f32 %v578_v36, %v184_v54 }
  0xc5   :  { %262 = vmatmul.f32.gmra.mxu1 %v398_v55 }
  0xc6   :  { %399 = vtanh.f32 %v185_v56 }
  0xcb   :  { %v187_v57 = vpop.f32.mrf.mxu0 }
  0xcc   :  { %v400_v58 = vpop.eup %399  ;;  %v188_v59 = vadd.f32 %v578_v36, %v187_v57 }
  0xcd   :  { %265 = vmatmul.f32.gmra.mxu1 %v400_v58  ;;  %v98_v58 = vld [vmem:[#allocation6 + $0x2] sm:$0x1] }
  0xce   :  { %401 = vtanh.f32 %v188_v59  ;;  %v532_v59 = vmov 0  }
  0xcf   :  { %384 = vset.pattern.permute.xlu0 %v532_v59 }
  0xd0   :  { %316 = vperm.xlu0 %384, %v98_v58  }
  0xd3   :  { %v190_v60 = vpop.f32.mrf.mxu0 }
  0xd4   :  { %v402_v61 = vpop.eup %401  ;;  %v191_v62 = vadd.f32 %v578_v36, %v190_v60 }
  0xd5   :  { %268 = vmatmul.f32.gmra.mxu1 %v402_v61 }
  0xd6   :  { %403 = vtanh.f32 %v191_v62 }
  0xdb   :  { %v193_v63 = vpop.f32.mrf.mxu0 }
  0xdc   :  { %v404_v0 = vpop.eup %403  ;;  %v194_v1 = vadd.f32 %v578_v36, %v193_v63 }
  0xdd   :  { %271 = vmatmul.f32.gmra.mxu1 %v404_v0 }
  0xde   :  { %405 = vtanh.f32 %v194_v1 }
  0xe3   :  { %v196_v2 = vpop.f32.mrf.mxu0 }
  0xe4   :  { %v406_v3 = vpop.eup %405  ;;  %v197_v4 = vadd.f32 %v578_v36, %v196_v2 }
  0xe5   :  { %274 = vmatmul.f32.vlgmr.msra.gmra.mxu3 %v406_v3 }
  0xe6   :  { %407 = vtanh.f32 %v197_v4 }
  0xeb   :  { %v199_v5 = vpop.f32.mrf.mxu0 }
  0xec   :  { %v408_v6 = vpop.eup %407  ;;  %v200_v7 = vadd.f32 %v578_v36, %v199_v5 }
  0xed   :  { %277 = vmatmul.f32.gmra.mxu3 %v408_v6 }
  0xee   :  { %409 = vtanh.f32 %v200_v7 }
  0xf3   :  { %v202_v8 = vpop.f32.mrf.mxu0 }
  0xf4   :  { %v410_v9 = vpop.eup %409  ;;  %v203_v10 = vadd.f32 %v578_v36, %v202_v8  ;;  %v313_v8 = vld [vmem:[#allocation4 + $0x100] sm:$0xff] }
  0xf5   :  { %280 = vmatmul.f32.gmra.mxu3 %v410_v9 }
  0xf6   :  { %411 = vtanh.f32 %v203_v10 }
  0xfb   :  { %v205_v11 = vpop.f32.mrf.mxu0 }
  0xfc   :  { %v412_v12 = vpop.eup %411  ;;  %v206_v13 = vadd.f32 %v578_v36, %v205_v11 }
  0xfd   :  { %283 = vmatmul.f32.gmra.mxu3 %v412_v12 }
  0xfe   :  { %413 = vtanh.f32 %v206_v13 }
 0x103   :  { %v208_v14 = vpop.f32.mrf.mxu0 }
 0x104   :  { %v414_v15 = vpop.eup %413  ;;  %v209_v16 = vadd.f32 %v578_v36, %v208_v14 }
 0x105   :  { %286 = vmatmul.f32.gmra.mxu3 %v414_v15 }
 0x106   :  { %415 = vtanh.f32 %v209_v16 }
 0x10b   :  { %v211_v17 = vpop.f32.mrf.mxu0 }
 0x10c   :  { %v416_v18 = vpop.eup %415  ;;  %v212_v19 = vadd.f32 %v578_v36, %v211_v17 }
 0x10d   :  { %289 = vmatmul.f32.gmra.mxu3 %v416_v18 }
 0x10e   :  { %417 = vtanh.f32 %v212_v19 }
 0x114   :  { %v418_v20 = vpop.eup %417 }
 0x115   :  { %292 = vmatmul.f32.gmra.mxu3 %v418_v20 }
 0x11a   :  { %v596_v21 = vpop.f32.mrf.mxu1 }
 0x11b   :  { %v249_v4 = vadd.f32 %v602_v33, %v596_v21 }
 0x122   :  { %v598_v23 = vpop.f32.mrf.mxu1 }
 0x123   :  { %v252_v2 = vadd.f32 %v602_v33, %v598_v23 }
 0x12a   :  { %v600_v25 = vpop.f32.mrf.mxu1 }
 0x12b   :  { %v255_v0 = vadd.f32 %v602_v33, %v600_v25 }
 0x132   :  { %v257_v27 = vpop.f32.mrf.mxu1 }
 0x133   :  { %v258_v62 = vadd.f32 %v602_v33, %v257_v27 }
 0x13a   :  { %v260_v29 = vpop.f32.mrf.mxu1 }
 0x13b   :  { %v261_v60 = vadd.f32 %v602_v33, %v260_v29 }
 0x142   :  { %v263_v32 = vpop.f32.mrf.mxu1  ;;  %v317_v9 = vpop.permute.xlu0 %316 }
 0x143   :  { %v264_v56 = vadd.f32 %v602_v33, %v263_v32 }
 0x14a   :  { %v266_v37 = vpop.f32.mrf.mxu1 }
 0x14b   :  { %v267_v54 = vadd.f32 %v602_v33, %v266_v37 }
 0x152   :  { %v269_v42 = vpop.f32.mrf.mxu1 }
 0x153   :  { %v270_v52 = vadd.f32 %v602_v33, %v269_v42 }
 0x15a   :  { %v272_v48 = vpop.f32.mrf.mxu1 }
 0x15b   :  { %v273_v50 = vadd.f32 %v602_v33, %v272_v48 }
 0x168   :  { %v275_v22 = vpop.f32.mrf.mxu3 }
 0x169   :  { %v276_v47 = vadd.f32 %v602_v33, %v275_v22 }
 0x170   :  { %v278_v24 = vpop.f32.mrf.mxu3 }
 0x171   :  { %v279_v45 = vadd.f32 %v602_v33, %v278_v24 }
 0x178   :  { %v281_v26 = vpop.f32.mrf.mxu3 }
 0x179   :  { %v282_v43 = vadd.f32 %v602_v33, %v281_v26 }
 0x180   :  { %v284_v28 = vpop.f32.mrf.mxu3 }
 0x181   :  { %v285_v40 = vadd.f32 %v602_v33, %v284_v28 }
 0x188   :  { %v287_v30 = vpop.f32.mrf.mxu3 }
 0x189   :  { %v288_v38 = vadd.f32 %v602_v33, %v287_v30 }
 0x190   :  { %v290_v31 = vpop.f32.mrf.mxu3 }
 0x191   :  { %v291_v36 = vadd.f32 %v602_v33, %v290_v31 }
 0x198   :  { %v293_v34 = vpop.f32.mrf.mxu3 }
 0x199   :  { %v294_v35 = vadd.f32 %v602_v33, %v293_v34 }
 0x19b   :  { %419 = vtanh.f32 %v294_v35 }
 0x19c   :  { %421 = vtanh.f32 %v291_v36 }
 0x19d   :  { %423 = vtanh.f32 %v288_v38 }
 0x19e   :  { %425 = vtanh.f32 %v285_v40 }
 0x19f   :  { %427 = vtanh.f32 %v282_v43 }
 0x1a0   :  { %429 = vtanh.f32 %v279_v45 }
 0x1a1   :  { %v420_v39 = vpop.eup %419  ;;  %431 = vtanh.f32 %v276_v47 }
 0x1a2   :  { %319 = vmatpush.xpose.msra.mxu2 %v420_v39  ;;  %v422_v41 = vpop.eup %421  ;;  %433 = vtanh.f32 %v273_v50 }
 0x1a3   :  { %v424_v44 = vpop.eup %423  ;;  %435 = vtanh.f32 %v270_v52 }
 0x1a4   :  { %v426_v46 = vpop.eup %425  ;;  %437 = vtanh.f32 %v267_v54 }
 0x1a5   :  { %v428_v49 = vpop.eup %427  ;;  %439 = vtanh.f32 %v264_v56 }
 0x1a6   :  { %320 = vmatpush.xpose.msra.mxu2 %v422_v41  ;;  %v430_v51 = vpop.eup %429  ;;  %441 = vtanh.f32 %v261_v60 }
 0x1a7   :  { %v432_v53 = vpop.eup %431  ;;  %443 = vtanh.f32 %v258_v62 }
 0x1a8   :  { %v434_v55 = vpop.eup %433  ;;  %445 = vtanh.f32 %v255_v0 }
 0x1a9   :  { %v436_v57 = vpop.eup %435  ;;  %447 = vtanh.f32 %v252_v2 }
 0x1aa   :  { %321 = vmatpush.xpose.msra.mxu2 %v424_v44  ;;  %v438_v61 = vpop.eup %437  ;;  %449 = vtanh.f32 %v249_v4 }
 0x1ab   :  { %v440_v63 = vpop.eup %439 }
 0x1ac   :  { %v442_v1 = vpop.eup %441 }
 0x1ad   :  { %v444_v3 = vpop.eup %443 }
 0x1ae   :  { %322 = vmatpush.xpose.msra.mxu2 %v426_v46  ;;  %v446_v5 = vpop.eup %445 }
 0x1af   :  { %v448_v6 = vpop.eup %447 }
 0x1b0   :  { %v450_v7 = vpop.eup %449 }
 0x1b2   :  { %323 = vmatpush.xpose.msra.mxu2 %v428_v49 }
 0x1b6   :  { %324 = vmatpush.xpose.msra.mxu2 %v430_v51 }
 0x1ba   :  { %325 = vmatpush.xpose.msra.mxu2 %v432_v53 }
 0x1be   :  { %326 = vmatpush.xpose.msra.mxu2 %v434_v55 }
 0x1c2   :  { %327 = vmatpush.xpose.msra.mxu2 %v436_v57 }
 0x1c6   :  { %328 = vmatpush.xpose.msra.mxu2 %v438_v61 }
 0x1ca   :  { %329 = vmatpush.xpose.msra.mxu2 %v440_v63 }
 0x1ce   :  { %330 = vmatpush.xpose.msra.mxu2 %v442_v1 }
 0x1d2   :  { %331 = vmatpush.xpose.msra.mxu2 %v444_v3 }
 0x1d6   :  { %332 = vmatpush.xpose.msra.mxu2 %v446_v5 }
 0x1da   :  { %333 = vmatpush.xpose.msra.mxu2 %v448_v6 }
 0x1de   :  { %334 = vmatpush.xpose.msra.mxu2 %v450_v7 }
 0x1e1   :  { %335 = vmatmul.f32.vlgmr.msra.gmra.mxu2 %v313_v8 }
 0x264   :  { %v336_v10 = vpop.f32.mrf.mxu2 }
 0x265   :  { %v337_v11 = vadd.f32 %v336_v10, %v317_v9 }
 0x267   :  { %339 = vst [vmem:[%s629_s3] sm:$0x1] %v337_v11 }
 0x268   :  { %344 = vsyncpa [#allocation3], 1 }
 0x269   :  { %345 = vsyncpa [#allocation5], 1 }

</bundles_post_ra>
